<compile_context>
chip_gen: v7x
topology: tpu7x:2x2x1
jax: 0.10.0
libtpu: 0.0.40
codegen_flags: <defaults>
</compile_context>

<pallas_src>
import functools

import jax
import jax.numpy as jnp
from jax.experimental import pallas as pl
from jax.experimental.pallas import tpu as pltpu

LN_EPS = 1e-5
VMEM_LIMIT = 64 * 1024 * 1024  # keep within v7x physical VMEM; plenty of headroom on v5e/v6e


# ----------------------------- helpers -----------------------------

def _pick_tile(n, target, mult):
    """Largest divisor of n that is <= target and a multiple of `mult`; else n (full)."""
    if n <= target:
        return n
    for t in range(target, 0, -1):
        if n % t == 0 and t % mult == 0:
            return t
    return n


def _layernorm_f32(x, gamma, beta):
    mu = jnp.mean(x, axis=-1, keepdims=True)
    var = jnp.mean((x - mu) ** 2, axis=-1, keepdims=True)
    return (x - mu) * jax.lax.rsqrt(var + LN_EPS) * gamma + beta


# ----------------------------- kernel 1/2: LN + projection to heads -----------------------------

def ln_proj_heads_kernel(x_ref, g_ref, b_ref, w_ref, *out_refs, head_dim):
    # x_ref: (1, rows, C) ; w_ref: (C, n_out*H*hd) ; out_refs[o]: (1, H, rows, hd)
    x = x_ref[0].astype(jnp.float32)
    xn = _layernorm_f32(x, g_ref[...].astype(jnp.float32), b_ref[...].astype(jnp.float32))
    y = jnp.dot(xn.astype(x_ref.dtype), w_ref[...],
                preferred_element_type=jnp.float32)            # (rows, n_out*H*hd)
    num_heads = out_refs[0].shape[1]
    for oi, o_ref in enumerate(out_refs):
        for h in range(num_heads):
            c0 = (oi * num_heads + h) * head_dim
            o_ref[0, h] = y[:, c0:c0 + head_dim].astype(o_ref.dtype)


def ln_project_to_heads(x, gamma, beta, w, num_heads, num_outputs, *, row_tile_target=256):
    B, N, C = x.shape
    hd = C // num_heads
    tr = _pick_tile(N, row_tile_target, 8)
    g2 = gamma.reshape(1, C)
    b2 = beta.reshape(1, C)

    def rows_map(b, i):
        return (b, i, 0)

    def const_map(b, i):
        return (0, 0)

    def heads_map(b, i):
        return (b, 0, i, 0)

    out_shape = tuple(jax.ShapeDtypeStruct((B, num_heads, N, hd), x.dtype)
                      for _ in range(num_outputs))
    out_specs = tuple(pl.BlockSpec((1, num_heads, tr, hd), heads_map)
                      for _ in range(num_outputs))

    res = pl.pallas_call(
        functools.partial(ln_proj_heads_kernel, head_dim=hd),
        out_shape=out_shape,
        grid=(B, N // tr),
        in_specs=[
            pl.BlockSpec((1, tr, C), rows_map),   # x rows
            pl.BlockSpec((1, C), const_map),      # LN gamma
            pl.BlockSpec((1, C), const_map),      # LN beta
            pl.BlockSpec(w.shape, const_map),     # projection weight (resident)
        ],
        out_specs=out_specs,
        compiler_params=pltpu.CompilerParams(
            dimension_semantics=("parallel", "parallel"),
            vmem_limit_bytes=VMEM_LIMIT),
    )(x, g2, b2, w)
    return res if isinstance(res, (tuple, list)) else (res,)


# ----------------------------- kernel 3: per-(batch, head) attention -----------------------------

def cross_attn_kernel(q_ref, k_ref, v_ref, o_ref, *, scale):
    # q_ref: (1,1,Nq,hd)  k_ref/v_ref: (1,1,Nk,hd)
    q = (q_ref[0, 0].astype(jnp.float32) * scale).astype(q_ref.dtype)  # fold scale into q
    k = k_ref[0, 0]
    v = v_ref[0, 0]
    s = jax.lax.dot_general(q, k, (((1,), (1,)), ((), ())),
                            preferred_element_type=jnp.float32)        # (Nq, Nk)
    m = jnp.max(s, axis=-1, keepdims=True)
    p = jnp.exp(s - m)
    denom = jnp.sum(p, axis=-1, keepdims=True)
    o = jnp.dot(p.astype(v.dtype), v, preferred_element_type=jnp.float32)
    o = o * pl.reciprocal(denom, approx=True)                          # one EUP recip per row
    o_ref[0, 0] = o.astype(o_ref.dtype)


def multi_head_attention(q_heads, k_heads, v_heads, scale):
    B, H, Nq, hd = q_heads.shape
    Nk = k_heads.shape[2]

    def qmap(b, h):
        return (b, h, 0, 0)

    return pl.pallas_call(
        functools.partial(cross_attn_kernel, scale=scale),
        out_shape=jax.ShapeDtypeStruct((B, H, Nq, hd), q_heads.dtype),
        grid=(B, H),
        in_specs=[
            pl.BlockSpec((1, 1, Nq, hd), qmap),
            pl.BlockSpec((1, 1, Nk, hd), qmap),
            pl.BlockSpec((1, 1, Nk, hd), qmap),
        ],
        out_specs=pl.BlockSpec((1, 1, Nq, hd), qmap),
        compiler_params=pltpu.CompilerParams(
            dimension_semantics=("parallel", "parallel"),
            vmem_limit_bytes=VMEM_LIMIT),
    )(q_heads, k_heads, v_heads)


# ----------------------------- kernel 4: proj + residual + LN2 + MLP -----------------------------

def post_attn_kernel(q_ref, a_ref, gq_ref, bq_ref, wp_ref, bp_ref,
                     g2_ref, b2_ref, w1_ref, b1_ref, w2_ref, bm2_ref,
                     o_ref, acc_sc, xn_sc):
    j = pl.program_id(2)

    @pl.when(j == 0)
    def _():
        # LN_q on the raw q rows (residual uses the normalized q, as in the PyTorch code).
        q = q_ref[0].astype(jnp.float32)                                   # (tq, C)
        qn = _layernorm_f32(q, gq_ref[...].astype(jnp.float32),
                            bq_ref[...].astype(jnp.float32))
        # Re-assemble attention heads -> (tq, C) inside VMEM (no HBM transpose).
        num_heads = a_ref.shape[1]
        a2 = jnp.concatenate([a_ref[0, h] for h in range(num_heads)], axis=-1)
        x = qn + jnp.dot(a2, wp_ref[...], preferred_element_type=jnp.float32) \
               + bp_ref[...].astype(jnp.float32)
        xn = _layernorm_f32(x, g2_ref[...].astype(jnp.float32),
                            b2_ref[...].astype(jnp.float32))
        acc_sc[...] = x
        xn_sc[...] = xn.astype(xn_sc.dtype)

    # MLP hidden tile j: acc += gelu(xn @ W1_j + b1_j) @ W2_j
    h = jnp.dot(xn_sc[...], w1_ref[...], preferred_element_type=jnp.float32) \
        + b1_ref[...].astype(jnp.float32)
    h = jax.nn.gelu(h, approximate=False)                                  # erf GELU (torch default)
    acc_sc[...] += jnp.dot(h.astype(w2_ref.dtype), w2_ref[...],
                           preferred_element_type=jnp.float32)

    @pl.when(j == pl.num_programs(2) - 1)
    def _():
        o_ref[0] = (acc_sc[...] + bm2_ref[...].astype(jnp.float32)).astype(o_ref.dtype)


def post_attention(q, a_heads, params, *, row_tile_target=256, hidden_tile_target=1024):
    B, Nq, C = q.shape
    H = a_heads.shape[1]
    hd = C // H
    hidden = params["w1"].shape[1]
    tq = _pick_tile(Nq, row_tile_target, 8)
    th = _pick_tile(hidden, hidden_tile_target, 128)

    def rows_map(b, i, j):
        return (b, i, 0)

    def heads_map(b, i, j):
        return (b, 0, i, 0)

    def const_map(b, i, j):
        return (0, 0)

    def w1_map(b, i, j):
        return (0, j)

    def w2_map(b, i, j):
        return (j, 0)

    gq = params["normq_g"].reshape(1, C)
    bq = params["normq_b"].reshape(1, C)
    g2 = params["norm2_g"].reshape(1, C)
    b2 = params["norm2_b"].reshape(1, C)
    bp = params["bproj"].reshape(1, C)
    b1 = params["b1"].reshape(1, hidden)
    bm2 = params["b2"].reshape(1, C)

    return pl.pallas_call(
        post_attn_kernel,
        out_shape=jax.ShapeDtypeStruct((B, Nq, C), q.dtype),
        grid=(B, Nq // tq, hidden // th),
        in_specs=[
            pl.BlockSpec((1, tq, C), rows_map),        # raw q rows
            pl.BlockSpec((1, H, tq, hd), heads_map),   # attention output (head-major)
            pl.BlockSpec((1, C), const_map),           # normq gamma
            pl.BlockSpec((1, C), const_map),           # normq beta
            pl.BlockSpec((C, C), const_map),           # Wproj (resident)
            pl.BlockSpec((1, C), const_map),           # bproj
            pl.BlockSpec((1, C), const_map),           # norm2 gamma
            pl.BlockSpec((1, C), const_map),           # norm2 beta
            pl.BlockSpec((C, th), w1_map),             # W1 hidden tile (streamed)
            pl.BlockSpec((1, th), w1_map),             # b1 hidden tile
            pl.BlockSpec((th, C), w2_map),             # W2 hidden tile (streamed)
            pl.BlockSpec((1, C), const_map),           # fc2 bias
        ],
        out_specs=pl.BlockSpec((1, tq, C), rows_map),
        scratch_shapes=[
            pltpu.VMEM((tq, C), jnp.float32),          # accumulator: x + partial MLP sums
            pltpu.VMEM((tq, C), q.dtype),              # LN2 output reused across hidden tiles
        ],
        compiler_params=pltpu.CompilerParams(
            dimension_semantics=("parallel", "parallel", "arbitrary"),
            vmem_limit_bytes=VMEM_LIMIT),
    )(q, a_heads, gq, bq, params["wproj"], bp, g2, b2,
      params["w1"], b1, params["w2"], bm2)


# ----------------------------- full forward -----------------------------

def attention_block_forward(q, kv, params):
    B, Nq, C = q.shape
    H = params["num_heads"]
    hd = C // H
    scale = hd ** (-0.5)

    (q_heads,) = ln_project_to_heads(q, params["normq_g"], params["normq_b"],
                                     params["wq"], H, 1)
    k_heads, v_heads = ln_project_to_heads(kv, params["normkv_g"], params["normkv_b"],
                                           params["wkv"], H, 2)
    a_heads = multi_head_attention(q_heads, k_heads, v_heads, scale)
    return post_attention(q, a_heads, params)


# ----------------------------- param init -----------------------------

def init_params(key, dim, num_heads, mlp_ratio=4.0, dtype=jnp.float32):
    hidden = int(dim * mlp_ratio)
    ks = jax.random.split(key, 6)
    s = 0.02
    return {
        "num_heads": num_heads,
        # LayerNorms (torch default init)
        "normq_g": jnp.ones((dim,), dtype), "normq_b": jnp.zeros((dim,), dtype),
        "normkv_g": jnp.ones((dim,), dtype), "normkv_b": jnp.zeros((dim,), dtype),
        "norm2_g": jnp.ones((dim,), dtype), "norm2_b": jnp.zeros((dim,), dtype),
        # Cross_Attention weights, stored as (in, out)
        "wq": (s * jax.random.normal(ks[0], (dim, dim))).astype(dtype),
        "wkv": (s * jax.random.normal(ks[1], (dim, 2 * dim))).astype(dtype),
        "wproj": (s * jax.random.normal(ks[2], (dim, dim))).astype(dtype),
        "bproj": jnp.zeros((dim,), dtype),
        # Mlp
        "w1": (s * jax.random.normal(ks[3], (dim, hidden))).astype(dtype),
        "b1": jnp.zeros((hidden,), dtype),
        "w2": (s * jax.random.normal(ks[4], (hidden, dim))).astype(dtype),
        "b2": jnp.zeros((dim,), dtype),
    }


# ----------------------------- pure-JAX reference (for self-check) -----------------------------

def reference_forward(q, kv, p):
    H = p["num_heads"]
    B, Nq, C = q.shape
    Nk = kv.shape[1]
    hd = C // H

    def ln(x, g, b):
        mu = x.mean(-1, keepdims=True)
        var = ((x - mu) ** 2).mean(-1, keepdims=True)
        return (x - mu) / jnp.sqrt(var + LN_EPS) * g + b

    qn = ln(q, p["normq_g"], p["normq_b"])
    kvn = ln(kv, p["normkv_g"], p["normkv_b"])
    qh = (qn @ p["wq"]).reshape(B, Nq, H, hd).transpose(0, 2, 1, 3)
    kvh = (kvn @ p["wkv"]).reshape(B, Nk, 2, H, hd).transpose(2, 0, 3, 1, 4)
    k, v = kvh[0], kvh[1]
    attn = jax.nn.softmax((qh @ k.transpose(0, 1, 3, 2)) * (hd ** -0.5), axis=-1)
    a = (attn @ v).transpose(0, 2, 1, 3).reshape(B, Nq, C)
    x = qn + a @ p["wproj"] + p["bproj"]
    xn = ln(x, p["norm2_g"], p["norm2_b"])
    mlp = jax.nn.gelu(xn @ p["w1"] + p["b1"], approximate=False) @ p["w2"] + p["b2"]
    return x + mlp


# ----------------------------- main -----------------------------

if __name__ == "__main__":
    B, Nq, Nkv, C, H = 2, 8, 8, 32, 4
    key = jax.random.PRNGKey(0)
    kq, kkv, kp = jax.random.split(key, 3)
    q = jax.random.normal(kq, (B, Nq, C), jnp.float32)
    k_v = jax.random.normal(kkv, (B, Nkv, C), jnp.float32)
    params = init_params(kp, C, H)

    out = attention_block_forward(q, k_v, params)
    out = jax.block_until_ready(out)
    assert out.shape == (B, Nq, C) and out.dtype == jnp.float32

    ref = jax.block_until_ready(reference_forward(q, k_v, params))
    assert jnp.allclose(out, ref, atol=2e-2, rtol=2e-2), \
        f"max abs err {float(jnp.max(jnp.abs(out - ref)))}"

    print("KERNEL_OK")
</pallas_src>

<mosaic_0001>
module attributes {stable_mosaic.version = 11 : i64} {
  func.func @ln_proj_heads_kernel(%arg0: i32, %arg1: i32, %arg2: memref<1x8x32xf32, #tpu.memory_space<vmem>>, %arg3: memref<1x32xf32, #tpu.memory_space<vmem>>, %arg4: memref<1x32xf32, #tpu.memory_space<vmem>>, %arg5: memref<32x32xf32, #tpu.memory_space<vmem>>, %arg6: memref<1x4x8x8xf32, #tpu.memory_space<vmem>>) attributes {dimension_semantics = [#tpu.dimension_semantics<parallel>, #tpu.dimension_semantics<parallel>], iteration_bounds = array<i64: 2, 1>, scalar_prefetch = 0 : i64, scratch_operands = 0 : i64, tpu.core_type = #tpu.core_type<tc>, window_params = [{transform_indices = @transform_0, window_bounds = array<i64: 1, 8, 32>}, {pipeline_mode = #tpu.pipeline_mode<synchronous>, transform_indices = @transform_1, window_bounds = array<i64: 1, 32>}, {pipeline_mode = #tpu.pipeline_mode<synchronous>, transform_indices = @transform_2, window_bounds = array<i64: 1, 32>}, {pipeline_mode = #tpu.pipeline_mode<synchronous>, transform_indices = @transform_3, window_bounds = array<i64: 32, 32>}, {transform_indices = @transform_4, window_bounds = array<i64: 1, 4, 8, 8>}]} {
    %c0 = arith.constant 0 : index
    %c0_0 = arith.constant 0 : index
    %c0_1 = arith.constant 0 : index
    %0 = vector.load %arg2[%c0, %c0_0, %c0_1] : memref<1x8x32xf32, #tpu.memory_space<vmem>>, vector<1x8x32xf32>
    %1 = vector.shape_cast %0 : vector<1x8x32xf32> to vector<8x32xf32>
    %c0_2 = arith.constant 0 : index
    %c0_3 = arith.constant 0 : index
    %2 = vector.load %arg3[%c0_2, %c0_3] : memref<1x32xf32, #tpu.memory_space<vmem>>, vector<1x32xf32>
    %c0_4 = arith.constant 0 : index
    %c0_5 = arith.constant 0 : index
    %3 = vector.load %arg4[%c0_4, %c0_5] : memref<1x32xf32, #tpu.memory_space<vmem>>, vector<1x32xf32>
    %cst = arith.constant dense<0.000000e+00> : vector<8xf32>
    %4 = vector.multi_reduction <add>, %1, %cst [1] : vector<8x32xf32> to vector<8xf32>
    %5 = vector.shape_cast %4 : vector<8xf32> to vector<8x1xf32>
    %cst_6 = arith.constant 3.200000e+01 : f32
    %6 = vector.broadcast %cst_6 : f32 to vector<8x1xf32>
    %7 = arith.divf %5, %6 : vector<8x1xf32>
    %8 = vector.broadcast %7 : vector<8x1xf32> to vector<8x32xf32>
    %9 = arith.subf %1, %8 : vector<8x32xf32>
    %10 = arith.mulf %9, %9 : vector<8x32xf32>
    %cst_7 = arith.constant dense<0.000000e+00> : vector<8xf32>
    %11 = vector.multi_reduction <add>, %10, %cst_7 [1] : vector<8x32xf32> to vector<8xf32>
    %12 = vector.shape_cast %11 : vector<8xf32> to vector<8x1xf32>
    %cst_8 = arith.constant 3.200000e+01 : f32
    %13 = vector.broadcast %cst_8 : f32 to vector<8x1xf32>
    %14 = arith.divf %12, %13 : vector<8x1xf32>
    %15 = vector.broadcast %7 : vector<8x1xf32> to vector<8x32xf32>
    %16 = arith.subf %1, %15 : vector<8x32xf32>
    %cst_9 = arith.constant 9.99999974E-6 : f32
    %17 = vector.broadcast %cst_9 : f32 to vector<8x1xf32>
    %18 = arith.addf %14, %17 : vector<8x1xf32>
    %19 = math.rsqrt %18 : vector<8x1xf32>
    %20 = vector.broadcast %19 : vector<8x1xf32> to vector<8x32xf32>
    %21 = arith.mulf %16, %20 : vector<8x32xf32>
    %22 = vector.broadcast %2 : vector<1x32xf32> to vector<8x32xf32>
    %23 = arith.mulf %21, %22 : vector<8x32xf32>
    %24 = vector.broadcast %3 : vector<1x32xf32> to vector<8x32xf32>
    %25 = arith.addf %23, %24 : vector<8x32xf32>
    %c0_10 = arith.constant 0 : index
    %c0_11 = arith.constant 0 : index
    %26 = vector.load %arg5[%c0_10, %c0_11] : memref<32x32xf32, #tpu.memory_space<vmem>>, vector<32x32xf32>
    %cst_12 = arith.constant dense<0.000000e+00> : vector<8x32xf32>
    %27 = tpu.matmul %25, %26, %cst_12 {dimension_numbers = #tpu.dot_dimension_numbers<[1], [0], [0], [1], [0, 0, 1, 1], [], []>} : vector<8x32xf32>, vector<32x32xf32>, vector<8x32xf32> -> vector<8x32xf32>
    %28 = vector.extract_strided_slice %27 {offsets = [0, 0], sizes = [8, 8], strides = [1, 1]} : vector<8x32xf32> to vector<8x8xf32>
    %c0_13 = arith.constant 0 : index
    %c0_14 = arith.constant 0 : index
    %c0_15 = arith.constant 0 : index
    %c0_16 = arith.constant 0 : index
    %29 = vector.load %arg6[%c0_13, %c0_14, %c0_15, %c0_16] : memref<1x4x8x8xf32, #tpu.memory_space<vmem>>, vector<1x1x8x8xf32>
    %30 = vector.shape_cast %29 : vector<1x1x8x8xf32> to vector<8x8xf32>
    %31 = vector.shape_cast %28 : vector<8x8xf32> to vector<1x1x8x8xf32>
    tpu.vector_store %arg6[%c0_13, %c0_14, %c0_15, %c0_16], %31 {strides = array<i32>} : memref<1x4x8x8xf32, #tpu.memory_space<vmem>>, vector<1x1x8x8xf32>,
    %32 = vector.extract_strided_slice %27 {offsets = [0, 8], sizes = [8, 8], strides = [1, 1]} : vector<8x32xf32> to vector<8x8xf32>
    %c0_17 = arith.constant 0 : index
    %c1 = arith.constant 1 : index
    %c0_18 = arith.constant 0 : index
    %c0_19 = arith.constant 0 : index
    %33 = vector.load %arg6[%c0_17, %c1, %c0_18, %c0_19] : memref<1x4x8x8xf32, #tpu.memory_space<vmem>>, vector<1x1x8x8xf32>
    %34 = vector.shape_cast %33 : vector<1x1x8x8xf32> to vector<8x8xf32>
    %35 = vector.shape_cast %32 : vector<8x8xf32> to vector<1x1x8x8xf32>
    tpu.vector_store %arg6[%c0_17, %c1, %c0_18, %c0_19], %35 {strides = array<i32>} : memref<1x4x8x8xf32, #tpu.memory_space<vmem>>, vector<1x1x8x8xf32>,
    %36 = vector.extract_strided_slice %27 {offsets = [0, 16], sizes = [8, 8], strides = [1, 1]} : vector<8x32xf32> to vector<8x8xf32>
    %c0_20 = arith.constant 0 : index
    %c2 = arith.constant 2 : index
    %c0_21 = arith.constant 0 : index
    %c0_22 = arith.constant 0 : index
    %37 = vector.load %arg6[%c0_20, %c2, %c0_21, %c0_22] : memref<1x4x8x8xf32, #tpu.memory_space<vmem>>, vector<1x1x8x8xf32>
    %38 = vector.shape_cast %37 : vector<1x1x8x8xf32> to vector<8x8xf32>
    %39 = vector.shape_cast %36 : vector<8x8xf32> to vector<1x1x8x8xf32>
    tpu.vector_store %arg6[%c0_20, %c2, %c0_21, %c0_22], %39 {strides = array<i32>} : memref<1x4x8x8xf32, #tpu.memory_space<vmem>>, vector<1x1x8x8xf32>,
    %40 = vector.extract_strided_slice %27 {offsets = [0, 24], sizes = [8, 8], strides = [1, 1]} : vector<8x32xf32> to vector<8x8xf32>
    %c0_23 = arith.constant 0 : index
    %c3 = arith.constant 3 : index
    %c0_24 = arith.constant 0 : index
    %c0_25 = arith.constant 0 : index
    %41 = vector.load %arg6[%c0_23, %c3, %c0_24, %c0_25] : memref<1x4x8x8xf32, #tpu.memory_space<vmem>>, vector<1x1x8x8xf32>
    %42 = vector.shape_cast %41 : vector<1x1x8x8xf32> to vector<8x8xf32>
    %43 = vector.shape_cast %40 : vector<8x8xf32> to vector<1x1x8x8xf32>
    tpu.vector_store %arg6[%c0_23, %c3, %c0_24, %c0_25], %43 {strides = array<i32>} : memref<1x4x8x8xf32, #tpu.memory_space<vmem>>, vector<1x1x8x8xf32>,
    return
  }
  func.func @transform_0(%arg0: i32, %arg1: i32) -> (i32, i32, i32) {
    %c0_i32 = arith.constant 0 : i32
    %c0_i32_0 = arith.constant 0 : i32
    return %arg0, %arg1, %c0_i32 : i32, i32, i32
  }
  func.func @transform_1(%arg0: i32, %arg1: i32) -> (i32, i32) {
    %c0_i32 = arith.constant 0 : i32
    %c0_i32_0 = arith.constant 0 : i32
    %c0_i32_1 = arith.constant 0 : i32
    return %c0_i32, %c0_i32_0 : i32, i32
  }
  func.func @transform_2(%arg0: i32, %arg1: i32) -> (i32, i32) {
    %c0_i32 = arith.constant 0 : i32
    %c0_i32_0 = arith.constant 0 : i32
    %c0_i32_1 = arith.constant 0 : i32
    return %c0_i32, %c0_i32_0 : i32, i32
  }
  func.func @transform_3(%arg0: i32, %arg1: i32) -> (i32, i32) {
    %c0_i32 = arith.constant 0 : i32
    %c0_i32_0 = arith.constant 0 : i32
    %c0_i32_1 = arith.constant 0 : i32
    return %c0_i32, %c0_i32_0 : i32, i32
  }
  func.func @transform_4(%arg0: i32, %arg1: i32) -> (i32, i32, i32, i32) {
    %c0_i32 = arith.constant 0 : i32
    %c0_i32_0 = arith.constant 0 : i32
    %c0_i32_1 = arith.constant 0 : i32
    return %arg0, %c0_i32, %arg1, %c0_i32_0 : i32, i32, i32, i32
  }
}

</mosaic_0001>

<bundles_post_ra>
// kernel: tpu_custom_call.1
= control target key start
LH: loop header
LB: loop body
LE: loop exit
PB: predicated region body
PF: predicated region fallthrough
CT: control target
= control target key end

     0   :  { %9 = vsyncpa [#allocation3], 0  ;;  %s1208_s0 = inlined_call_operand.hbm [shape: f32[2,8,32], index: 0, kind: input, shape index: {}]   ;;  %s1209_s1 = inlined_call_operand.hbm [shape: f32[1,32], index: 1, kind: input, shape index: {}]   ;;  %s1210_s2 = inlined_call_operand.hbm [shape: f32[1,32], index: 2, kind: input, shape index: {}]   ;;  %s1211_s3 = inlined_call_operand.hbm [shape: f32[32,32], index: 3, kind: input, shape index: {}]   ;;  %s1212_s4 = inlined_call_operand.hbm [shape: f32[2,4,8,8], index: 4, kind: output, shape index: {}]  }
   0x1   :  { %11 = vsyncpa [#allocation3 + $0x1], 0 }
   0x2   :  { %12 = vsyncpa [#allocation6], 0 }
   0x3   :  { %13 = vsyncpa [#allocation9], 0 }
   0x4   :  { %14 = vsyncpa [#allocation4], 0 }
   0x5   :  { %16 = vsyncpa [#allocation4 + $0x1], 0  ;;  %s925_s15 = smov 0   ;;  %s927_s16 = smov 0  }
   0x6   :  { %s929_s17 = smov 0   ;;  %s931_s18 = smov 0  }
   0x7   :  { %s933_s19 = smov 0   ;;  %s935_s20 = smov 0  }
   0x8 LB: > { %s525_s21 = sadd.s32 4294967295, %s883_s20   ;;  %s526_s22 = sadd.s32 4294967294, %s883_s20   ;;  %s883_s20 = sphi %s935_s20, %s22_s20   ;;  %s879_s19 = sphi %s933_s19, %s1236_s19   ;;  %s875_s18 = sphi %s931_s18, %s1235_s18   ;;  %s871_s17 = sphi %s929_s17, %s1234_s17   ;;  %s867_s16 = sphi %s927_s16, %s1233_s16   ;;  %s863_s15 = sphi %s925_s15, %s1232_s15  }
   0x9   : > { %p56_p0 = scmp.ne.s32.totalorder %s867_s16, %s863_s15  ;;  %p959_p1 = scmp.eq.s32.totalorder %s525_s21, 0 }
   0xa   : > { %p963_p2 = scmp.eq.s32.totalorder %s525_s21, 1  ;;  %p151_p3 = scmp.eq.s32.totalorder %s526_s22, 1 }
   0xb   : > { %s1217_s23 = scalar_select %p959_p1, 1, 0 }
   0xc   : > { %s1218_s24 = scalar_select %p963_p2, 1, 0 }
   0xd   : > { %p969_p4 = por %p959_p1, %p56_p0  ;;  %p527_p5 = scmp.ge.s32.totalorder %s883_s20, 1 }
   0xe   : > { %p974_p6 = por %p151_p3, %p56_p0  ;;  %p158_p7 = scmp.lt.s32.totalorder %s883_s20, 3 }
   0xf   : > { %s1219_s25 = scalar_select %p969_p4, 1, 0 }
  0x10   : > { %s1220_s26 = scalar_select %p974_p6, 1, 0 }
  0x11   : > { %p979_p8 = pnand %p527_p5, %p158_p7  ;;  %s885_s28 = smov [#allocation5]  }
  0x12   : > { %s171_s29 = sshll.u32 %s885_s28, 4  ;;  %s886_s30 = smov [#allocation7]   ;;  %s172_s29 = int_to_ptr.vmem [resolvable:$true] %s171_s29 }
  0x13   : > { %s1221_s27 = scalar_select %p979_p8, 1, 0 }
  0x14   : > { %p590_p10 = pneg %p979_p8  ;;  %s182_s5 = sshll.u32 %s886_s30, 4  ;;  %s992_s5 = int_to_ptr.vmem [resolvable:$true] %s182_s5 }
  0x15   : > { %s887_s7 = smov [#allocation8]   ;;  %s679_s11 = scalar_lea.hbm %s1209_s1, 16 }
  0x16   : > { %p988_p11 = pnand %p590_p10, %p959_p1  ;;  %s192_s8 = sshll.u32 %s887_s7, 4  ;;  %s994_s8 = int_to_ptr.vmem [resolvable:$true] %s192_s8 }
  0x17   : > { %p680_p12 = scmp.ne.s32.totalorder %s1209_s1, %s679_s11  ;;  %p686_p5 = scmp.lt.u32.totalorder %s679_s11, %s1209_s1 }
  0x18   : > { %p1004_p13 = pneg %p988_p11 }
  0x1a   : > { %p682_p0 = pnand %p1004_p13, %p680_p12 }
  0x1c   : > { %p683_p3 = pneg %p682_p0 }
  0x1e   : > { %p688_p7 = pnand %p686_p5, %p683_p3 }
  0x20   : > { %691 = shalt.err (!%p688_p7)
}
  0x21   : > { %s692_s28 = scalar_lea.vmem %s172_s29, 16  ;;  %s699_s30 = scalar_lea.vmem %s172_s29, 32 }
  0x22   : > { %p693_p10 = scmp.ne.s32.totalorder %s172_s29, %s692_s28  ;;  %p700_p1 = scmp.lt.s32.totalorder %s172_s29, %s172_s29 }
  0x23   : > { %p701_p4 = scmp.lt.s32.totalorder %s699_s30, %s692_s28 }
  0x24   : > { %p695_p9 = pnand %p693_p10, %p1004_p13 }
  0x25   : > { %p702_p8 = por %p701_p4, %p700_p1 }
  0x26   : > { %p696_p6 = pneg %p695_p9 }
  0x28   : > { %p703_p2 = pnand %p702_p8, %p696_p6 }
  0x2a   : > { %706 = shalt.err (!%p703_p2)
}
  0x2b   : > { %593 = dma.hbm_to_vmem [thread:$0]  (!%p988_p11), %s1209_s1, 16, %s172_s29, [#allocation6]  }
  0x2c   : > { %s707_s12 = scalar_lea.hbm %s1210_s2, 16 }
  0x2d   : > { %p708_p9 = scmp.ne.s32.totalorder %s1210_s2, %s707_s12  ;;  %p714_p2 = scmp.lt.u32.totalorder %s707_s12, %s1210_s2 }
  0x2f   : > { %p710_p12 = pnand %p708_p9, %p1004_p13 }
  0x31   : > { %p711_p1 = pneg %p710_p12 }
  0x33   : > { %p716_p4 = pnand %p714_p2, %p711_p1 }
  0x35   : > { %719 = shalt.err (!%p716_p4)
}
  0x36   : > { %s720_s29 = scalar_lea.vmem %s992_s5, 16  ;;  %s727_s30 = scalar_lea.vmem %s992_s5, 32 }
  0x37   : > { %p721_p6 = scmp.ne.s32.totalorder %s992_s5, %s720_s29  ;;  %p728_p3 = scmp.lt.s32.totalorder %s992_s5, %s992_s5 }
  0x38   : > { %p729_p5 = scmp.lt.s32.totalorder %s727_s30, %s720_s29 }
  0x39   : > { %p723_p8 = pnand %p721_p6, %p1004_p13 }
  0x3a   : > { %p730_p7 = por %p729_p5, %p728_p3 }
  0x3b   : > { %p724_p0 = pneg %p723_p8 }
  0x3d   : > { %p731_p10 = pnand %p730_p7, %p724_p0 }
  0x3f   : > { %734 = shalt.err (!%p731_p10)
}
  0x40   : > { %596 = dma.hbm_to_vmem [thread:$0]  (!%p988_p11), %s1210_s2, 16, %s992_s5, [#allocation6]  }
  0x41   : > { %s735_s12 = scalar_lea.hbm %s1211_s3, 512 }
  0x42   : > { %p736_p9 = scmp.ne.s32.totalorder %s1211_s3, %s735_s12  ;;  %p742_p2 = scmp.lt.u32.totalorder %s735_s12, %s1211_s3 }
  0x44   : > { %p738_p12 = pnand %p736_p9, %p1004_p13 }
  0x46   : > { %p739_p1 = pneg %p738_p12 }
  0x48   : > { %p744_p4 = pnand %p742_p2, %p739_p1 }
  0x4a   : > { %747 = shalt.err (!%p744_p4)
}
  0x4b   : > { %s748_s5 = scalar_lea.vmem %s994_s8, 512  ;;  %p756_p3 = scmp.lt.s32.totalorder %s994_s8, %s994_s8 }
  0x4c   : > { %p749_p6 = scmp.ne.s32.totalorder %s994_s8, %s748_s5  ;;  %p757_p5 = scmp.lt.s32.totalorder %s748_s5, %s748_s5 }
  0x4e   : > { %p751_p8 = pnand %p749_p6, %p1004_p13  ;;  %p758_p7 = por %p757_p5, %p756_p3 }
  0x50   : > { %p752_p0 = pneg %p751_p8 }
  0x52   : > { %p759_p10 = pnand %p758_p7, %p752_p0 }
  0x54   : > { %762 = shalt.err (!%p759_p10)
}
  0x55   : > { %s888_s29 = smov 128   ;;  %s889_s14 = smov 8  }
  0x56   : > { %599 = dma.hbm_to_vmem [thread:$0]  (!%p988_p11), %s1211_s3, 512, %s994_s8, [#allocation9], %s888_s29, %s888_s29, %s889_s14  }
  0x57   : > { %s43_s9 = sadd.s32 1, %s871_s17  ;;  %s34_s10 = sadd.s32 1, %s879_s19 }
  0x58   : > { %p50_p13 = scmp.ne.s32.totalorder %s871_s17, %s867_s16  ;;  %p36_p9 = scmp.ge.s32.totalorder %s34_s10, 2 }
  0x59   : > { %p51_p12 = scmp.eq.s32.totalorder %s883_s20, 0  ;;  %p1224_p1 = scmp.ne.s32.totalorder %s1218_s24, 0 }
  0x5a   : > { %p611_p4 = scmp.lt.s32.totalorder %s883_s20, 2  ;;  %s1238_s10 = smov (%p36_p9, %s34_s10), 0 }
  0x5b   : > { %p1074_p2 = por %p1224_p1, %p50_p13  ;;  %p52_p6 = por %p51_p12, %p50_p13 }
  0x5c   : > { %s206_s6 = sand.u32 1, %s871_s17   ;;  %s38_s12 = ssub.s32 %s879_s19, %s1238_s10 }
  0x5d   : > { %p41_p8 = scmp.eq.s32.totalorder %s38_s12, 0  ;;  %s532_s8 = sshll.u32 %s206_s6, 3 }
  0x5e   : > { %s533_s13 = sshll.u32 %s879_s19, 7  ;;  %s210_s5 = scalar_lea.vmem [#allocation2], %s532_s8 }
  0x5f   : > { %s1086_s21 = scalar_select %p41_p8, %s871_s17, %s43_s9  }
  0x60   : > { %s1091_s24 = scalar_lea.hbm %s1208_s0, %s533_s13  ;;  %s218_s29 = sshll.u32 %s210_s5, 4  ;;  %s1093_s29 = int_to_ptr.vmem [resolvable:$true] %s218_s29 }
  0x61   : > { %p1097_p11 = pnand %p611_p4, %p52_p6  ;;  %s207_s30 = scalar_lea.sflag [#allocation3], %s206_s6 }
  0x62   : > { %s763_s7 = scalar_lea.hbm %s1091_s24, 128  ;;  %s768_s8 = scalar_lea.hbm %s1208_s0, 256 }
  0x63   : > { %p764_p0 = scmp.ne.s32.totalorder %s1091_s24, %s763_s7  ;;  %p765_p3 = pneg %p1097_p11 }
  0x64   : > { %p769_p10 = scmp.lt.u32.totalorder %s1091_s24, %s1208_s0  ;;  %p770_p13 = scmp.lt.u32.totalorder %s768_s8, %s763_s7 }
  0x65   : > { %p766_p5 = pnand %p765_p3, %p764_p0  ;;  %p772_p12 = scmp.lt.u32.totalorder %s763_s7, %s1091_s24 }
  0x66   : > { %p771_p9 = por %p770_p13, %p769_p10 }
  0x67   : > { %p767_p7 = pneg %p766_p5 }
  0x68   : > { %p773_p1 = por %p772_p12, %p771_p9 }
  0x6a   : > { %p774_p4 = pnand %p773_p1, %p767_p7 }
  0x6c   : > { %777 = shalt.err (!%p774_p4)
}
  0x6d   : > { %s778_s6 = scalar_lea.vmem %s1093_s29, 128  ;;  %s890_s28 = smov [#allocation2]  }
  0x6e   : > { %p779_p6 = scmp.ne.s32.totalorder %s1093_s29, %s778_s6  ;;  %s783_s5 = sshll.u32 %s890_s28, 4  ;;  %s784_s5 = int_to_ptr.vmem [resolvable:$false] %s783_s5 }
  0x6f   : > { %s785_s9 = scalar_lea.vmem %s784_s5, 256  ;;  %p786_p5 = scmp.lt.s32.totalorder %s1093_s29, %s784_s5 }
  0x70   : > { %p781_p8 = pnand %p779_p6, %p765_p3  ;;  %p787_p10 = scmp.lt.s32.totalorder %s785_s9, %s778_s6 }
  0x72   : > { %p782_p0 = pneg %p781_p8  ;;  %p788_p13 = por %p787_p10, %p786_p5 }
  0x74   : > { %p789_p9 = pnand %p788_p13, %p782_p0 }
  0x76   : > { %792 = shalt.err (!%p789_p9)
}
  0x77   : > { %603 = dma.hbm_to_vmem [thread:$0]  (!%p1097_p11), %s1091_s24, 128, %s1093_s29, %s207_s30  }
  0x78   : > { %p1227_p7 = scmp.ne.s32.totalorder %s1221_s27, 0 }
  0x79   : > { %s1129_s7 = sand.u32 (!%p1227_p7), 1, %s867_s16   ;;  %p1228_p3 = scmp.ne.s32.totalorder (!%p1227_p7), %s1219_s25, 0 }
  0x7a   : > { %227 = sbr.rel (%p1227_p7) target bundleno = 795 (0x31b), region = 36  ;;  %s535_s12 = sshll.u32 (!%p1227_p7), %s1129_s7, 3 }
  0x7b   : > { %s230_s8 = scalar_lea.sflag (!%p1227_p7), [#allocation3], %s1129_s7  ;;  %s233_s13 = scalar_lea.vmem (!%p1227_p7), [#allocation2], %s535_s12 }
  0x81   : > { %846 = dma.done.wait (%p1228_p3), %s230_s8, 128  }
  0x82   : > { %848 = vsyncadd (%p1228_p3), %s230_s8, 4294967168  ;;  %p1229_p12 = scmp.ne.s32.totalorder %s1217_s23, 0 }
  0x84   : > { %850 = dma.done.wait (%p1229_p12), [#allocation6], 32  }
  0x85   : > { %852 = vsyncadd (%p1229_p12), [#allocation6], 4294967264 }
  0x86   : > { %854 = dma.done.wait (%p1229_p12), [#allocation9], 512  }
  0x87   : > { %856 = vsyncadd (%p1229_p12), [#allocation9], 4294966784  ;;  %vm273_vm0 = vcmask 261120   ;;  %v270_v0 = vld [vmem:[%s233_s13] sm:$0xff]  ;;  %v302_v7 = vld [vmem:[#allocation8] sm:$0xff]  ;;  %v891_v10 = vmov 0.0|0.0  }
  0x88   : > { %v274_v1 = vsel %vm273_vm0, %v270_v0, 0.0  ;;  %v303_v8 = vld [vmem:[#allocation8 + $0x8] sm:$0xff]  ;;  %v304_v9 = vld [vmem:[#allocation8 + $0x10] sm:$0xff]  ;;  %568 = vmatprep.subr.bf16.mxu0 %v891_v10  ;;  %v305_v12 = vld [vmem:[#allocation8 + $0x18] sm:$0xff]  ;;  %vm892_vm1 = vmmov 0   ;;  %v893_v13 = vmov 0.0  }
  0x89   : > { %275 = vadd.xlane.f32.xlu0 %v274_v1  ;;  %v569_v11 = vpack.c.bf16 %v303_v8, %v302_v7  ;;  %565 = vmatprep.mubr.msk.f32.mxu0 %vm892_vm1, %v893_v13  ;;  %v572_v14 = vpack.c.bf16 %v305_v12, %v304_v9  ;;  %v540_v19 = vld [vmem:[#allocation5] ss:$0 sm:$0xff]  ;;  %v541_v21 = vld [vmem:[#allocation7] ss:$0 sm:$0xff]  ;;  %s539_s23 = sshll.u32 %s1129_s7, 5  ;;  %vm379_vm2 = vcmask 64512  }
  0x8a   : > { %s269_s25 = scalar_lea.vmem [#allocation10], %s539_s23  ;;  %s894_s27 = smov 104  }
  0x8b   : > { %570 = vmatpush3.bf16.msra.mxu0 %v569_v11  ;;  %s895_s24 = smov 120   ;;  %s896_s29 = smov 112  }
  0x8c   : > { %571 = vmatprep.subr.bf16.mxu0 %v891_v10  ;;  %s412_s14 = sshll.u32 %s269_s25, 4  ;;  %s551_s30 = sshll.u32 %s875_s18, 9  ;;  %s1151_s14 = int_to_ptr.vmem [resolvable:$true] %s412_s14 }
  0x8d   : > { %s1158_s28 = scalar_lea.hbm %s1212_s4, %s551_s30  ;;  %s398_s18 = scalar_lea.sflag [#allocation4], %s1129_s7 }
  0x8e   : > { %s793_s5 = scalar_lea.vmem %s1151_s14, 512  ;;  %s897_s9 = smov [#allocation10]  }
  0x8f   : > { %573 = vmatpush3.bf16.msra.mxu0 %v572_v14  ;;  %p794_p11 = scmp.ne.s32.totalorder %s1151_s14, %s793_s5  ;;  %s797_s12 = sshll.u32 %s897_s9, 4  ;;  %s798_s12 = int_to_ptr.vmem [resolvable:$false] %s797_s12 }
  0x90   : > { %s799_s8 = scalar_lea.vmem %s798_s12, 1024  ;;  %p800_p6 = scmp.lt.s32.totalorder %s1151_s14, %s798_s12 }
  0x91   : > { %p795_p1 = pnand %p794_p11, %p1074_p2  ;;  %p801_p8 = scmp.lt.s32.totalorder %s799_s8, %s793_s5 }
  0x93   : > { %p796_p4 = pneg %p795_p1  ;;  %p802_p0 = por %p801_p8, %p800_p6 }
  0x95   : > { %p803_p5 = pnand %p802_p0, %p796_p4 }
 0x116   : > { %v276_v2 = vpop.xlane.xlu0 %275 }
 0x117   : > { %v278_v3 = vmul.f32 0.03125, %v276_v2 }
 0x119   : > { %v279_v4 = vsub.f32 %v270_v0, %v278_v3 }
 0x11b   : > { %v280_v5 = vmul.f32 %v279_v4, %v279_v4 }
 0x11d   : > { %v281_v6 = vsel %vm273_vm0, %v280_v5, 0.0 }
 0x11e   : > { %282 = vadd.xlane.f32.xlu0 %v281_v6 }
 0x1ab   : > { %v283_v15 = vpop.xlane.xlu0 %282 }
 0x1ac   : > { %v284_v16 = vmul.f32 0.03125, %v283_v15 }
 0x1ae   : > { %v285_v17 = vadd.f32 1e-05, %v284_v16 }
 0x1b0   : > { %677 = vrsqrt.f32 %v285_v17 }
 0x1ba   : > { %v678_v18 = vpop.eup %677 }
 0x1bb   : > { %v287_v20 = vmul.f32 %v678_v18, %v279_v4 }
 0x1bd   : > { %v294_v22 = vmul.f32 %v540_v19, %v287_v20 }
 0x1bf   : > { %v301_v23 = vadd.f32 %v541_v21, %v294_v22 }
 0x1c1   : > { %566 = vmatmul.mubr.msk.f32.vlgmr.msra.gmra.mrb[0].mxu0 %vm273_vm0, %v301_v23 }
 0x294   : > { %v375_v24 = vpop.f32.mrb[0].mxu0 }
 0x295   : > { %380 = vst.msk [vmem:[%s269_s25] sm:$0xff] %vm379_vm2, %v375_v24  ;;  %392 = vrot.lane.b32.xlu0 %v375_v24, %s894_s27  ;;  %382 = vrot.lane.b32.xlu1 %v375_v24, %s895_s24  ;;  %v567_v25 = vpop.f32.mrb[1].mxu0 }
 0x299   : > { %387 = vrot.lane.b32.xlu1 %v375_v24, %s896_s29 }
 0x307   : > { %v393_v26 = vpop.permute.xlu0 %392  ;;  %v383_v27 = vpop.permute.xlu1 %382 }
 0x308   : > { %545 = vst.msk [vmem:[%s269_s25 + $0x18] sm:$0xff] %vm379_vm2, %v393_v26  ;;  %543 = vst.msk [vmem:[%s269_s25 + $0x8] sm:$0xff] %vm379_vm2, %v383_v27 }
 0x30b   : > { %v388_v28 = vpop.permute.xlu1 %387 }
 0x30c   : > { %544 = vst.msk [vmem:[%s269_s25 + $0x10] sm:$0xff] %vm379_vm2, %v388_v28 }
 0x30d   : > { %806 = shalt.err (!%p803_p5)
}
 0x30e   : > { %s807_s13 = scalar_lea.hbm %s1158_s28, 512  ;;  %s811_s27 = scalar_lea.hbm %s1212_s4, 1024 }
 0x30f   : > { %p808_p10 = scmp.ne.s32.totalorder %s1158_s28, %s807_s13  ;;  %p812_p7 = scmp.lt.u32.totalorder %s1158_s28, %s1212_s4 }
 0x310   : > { %p813_p3 = scmp.lt.u32.totalorder %s811_s27, %s807_s13  ;;  %p815_p11 = scmp.lt.u32.totalorder %s807_s13, %s1158_s28 }
 0x311   : > { %p809_p13 = pnand %p808_p10, %p1074_p2 }
 0x312   : > { %p814_p12 = por %p813_p3, %p812_p7 }
 0x313   : > { %p810_p9 = pneg %p809_p13 }
 0x314   : > { %p816_p1 = por %p815_p11, %p814_p12 }
 0x316   : > { %p817_p4 = pnand %p816_p1, %p810_p9 }
 0x318   : > { %820 = shalt.err (!%p817_p4)
}
 0x319   : > { %s898_s30 = smov 128   ;;  %s899_s22 = smov 8  }
 0x31a   : > { %588 = dma.vmem_to_hbm [thread:$0]  (%p1074_p2), %s1151_s14, 512, %s1158_s28, %s398_s18, %s898_s30, %s898_s30, %s899_s22  }
 0x31b PF: > { %s427_s6 = sand.u32 1, %s863_s15   ;;  %p1230_p6 = scmp.ne.s32.totalorder %s1220_s26, 0 }
 0x31c   : > { %p1231_p8 = scmp.ge.s32.totalorder %s883_s20, 2  ;;  %s428_s5 = scalar_lea.sflag [#allocation4], %s427_s6 }
 0x31e   : > { %p605_p0 = pnand %p1231_p8, %p1230_p6 }
 0x320   : > { %858 = dma.done.wait (!%p605_p0), %s428_s5, 512  }
 0x321   : > { %860 = vsyncadd (!%p605_p0), %s428_s5, 4294966784  ;;  %s22_s20 = sadd.s32 1, %s883_s20   ;;  %s1232_s15 = smov %s867_s16 }
 0x322   : > { %p19_p5 = scmp.ge.s32.totalorder %s22_s20, 4   ;;  %s1233_s16 = smov %s871_s17 }
 0x323   : > { %s1234_s17 = smov %s1086_s21  ;;  %s1235_s18 = smov %s879_s19 }
 0x324   : > { %s1236_s19 = smov %s1238_s10  ;;  %21 = sbr.rel (!%p19_p5) target bundleno = 8 (0x8), region = 96 }
 0x32b   :  { %433 = vsyncpa [#allocation3], 1 }
 0x32c   :  { %435 = vsyncpa [#allocation3 + $0x1], 1 }
 0x32d   :  { %436 = vsyncpa [#allocation6], 1 }
 0x32e   :  { %437 = vsyncpa [#allocation9], 1 }
 0x32f   :  { %438 = vsyncpa [#allocation4], 1 }
 0x330   :  { %440 = vsyncpa [#allocation4 + $0x1], 1 }

</bundles_post_ra>
